<compile_context>
chip_gen: v5e
topology: v5e:2x2
jax: 0.10.0
libtpu: 0.0.40
codegen_flags: <defaults>
</compile_context>

<pallas_src>
import jax
import jax.numpy as jnp
from jax.experimental import pallas as pl
from jax.experimental.pallas import tpu as pltpu

P_DROP = 0.2
_SCALE = 1.0 / (1.0 - P_DROP)
# Drop when bits < P_DROP * 2**32  (integer compare, no int->float convert).
_KEEP_THRESHOLD = int(round(P_DROP * (1 << 32)))  # 858993459

_LANES = 128
_TILE_ROWS = 1024  # 1024*128*4B = 512 KiB/block; x + bits + out double-buffered
                   # = ~3 MiB VMEM -> comfortably fits v5e/v6e/v7x scoped limits.


def _dropout_kernel(x_ref, bits_ref, o_ref):
    keep = bits_ref[...] >= jnp.uint32(_KEEP_THRESHOLD)
    x = x_ref[...]
    o_ref[...] = jnp.where(keep, x * _SCALE, jnp.zeros_like(x)).astype(o_ref.dtype)


def advanced_expert_forward(x, w1, b1, w2, b2, seed):
    """Forward of AdvancedExpert.  x: [B, in_features]; weights in torch layout.

    The reference forward discards relu/fc1/fc2 and returns dropout(x), so the
    weights are dead with respect to the output (kept only for interface parity).
    """
    del w1, b1, w2, b2  # dead per the reference forward's overwritten assignments

    orig_shape = x.shape
    total = int(x.size)

    # Lane-dense view: flatten to [rows, 128] (pad the tail if necessary).
    rows = -(-total // _LANES)
    if rows >= _TILE_ROWS:
        tile_rows = _TILE_ROWS
        rows_padded = -(-rows // tile_rows) * tile_rows
    else:
        tile_rows = rows          # single block == full array dims (allowed)
        rows_padded = rows
    pad = rows_padded * _LANES - total

    flat = x.reshape(-1)
    if pad:
        flat = jnp.concatenate([flat, jnp.zeros((pad,), dtype=x.dtype)])
    x2 = flat.reshape(rows_padded, _LANES)

    # Per-element random bits (TODO(synk): cannot bit-match torch's RNG stream;
    # distributional dropout semantics with keep prob 0.8, scale 1/0.8 are kept).
    bits = jax.random.bits(jax.random.PRNGKey(seed), (rows_padded, _LANES),
                           dtype=jnp.uint32)

    spec = pl.BlockSpec((tile_rows, _LANES), lambda i: (i, 0))
    out2 = pl.pallas_call(
        _dropout_kernel,
        out_shape=jax.ShapeDtypeStruct((rows_padded, _LANES), x.dtype),
        grid=(rows_padded // tile_rows,),
        in_specs=[spec, spec],
        out_specs=spec,
        compiler_params=pltpu.CompilerParams(
            dimension_semantics=("parallel",)),
    )(x2, bits)

    return out2.reshape(-1)[:total].reshape(orig_shape)


if __name__ == "__main__":
    # Small shapes consistent with the module.  The reference forward's
    # (dead) fc2(x) call requires in_features == hidden_dim.
    batch = 8
    in_features = 32
    hidden_dim = 32
    out_features = 16

    key = jax.random.PRNGKey(0)
    kx, kw1, kb1, kw2, kb2 = jax.random.split(key, 5)

    x = jax.random.normal(kx, (batch, in_features), dtype=jnp.float32)

    # Deterministic "nn.Linear"-style init (uniform in +-1/sqrt(fan_in)).
    lim1 = 1.0 / (in_features ** 0.5)
    w1 = jax.random.uniform(kw1, (hidden_dim, in_features),
                            minval=-lim1, maxval=lim1, dtype=jnp.float32)
    b1 = jax.random.uniform(kb1, (hidden_dim,),
                            minval=-lim1, maxval=lim1, dtype=jnp.float32)
    lim2 = 1.0 / (hidden_dim ** 0.5)
    w2 = jax.random.uniform(kw2, (out_features, hidden_dim),
                            minval=-lim2, maxval=lim2, dtype=jnp.float32)
    b2 = jax.random.uniform(kb2, (out_features,),
                            minval=-lim2, maxval=lim2, dtype=jnp.float32)

    out = advanced_expert_forward(x, w1, b1, w2, b2, seed=1234)
    jax.block_until_ready(out)

    assert out.shape == (batch, in_features), out.shape

    # Every surviving element must equal x / (1 - p); dropped elements are 0.
    scaled = x / (1.0 - P_DROP)
    ok = jnp.all(jnp.isclose(out, scaled, atol=1e-6) | (out == 0.0))
    assert bool(ok), "dropout output inconsistent with x/(1-p) or 0"

    # Loose keep-rate sanity check (expected ~0.8).
    keep_frac = float(jnp.mean((out != 0.0).astype(jnp.float32)))
    assert 0.5 < keep_frac <= 1.0, keep_frac

    print("KERNEL_OK")
</pallas_src>

<mosaic_0001>
module attributes {stable_mosaic.version = 11 : i64} {
  func.func @_dropout_kernel(%arg0: i32, %arg1: memref<2x128xf32, #tpu.memory_space<vmem>>, %arg2: memref<2x128xi32, #tpu.memory_space<vmem>>, %arg3: memref<2x128xf32, #tpu.memory_space<vmem>>) attributes {dimension_semantics = [#tpu.dimension_semantics<parallel>], iteration_bounds = array<i64: 1>, scalar_prefetch = 0 : i64, scratch_operands = 0 : i64, tpu.core_type = #tpu.core_type<tc>, window_params = [{transform_indices = @transform_0, window_bounds = array<i64: 2, 128>}, {transform_indices = @transform_1, window_bounds = array<i64: 2, 128>}, {transform_indices = @transform_2, window_bounds = array<i64: 2, 128>}]} {
    %c0 = arith.constant 0 : index
    %c0_0 = arith.constant 0 : index
    %0 = vector.load %arg2[%c0, %c0_0] : memref<2x128xi32, #tpu.memory_space<vmem>>, vector<2x128xi32>
    %c858993459_i32 = arith.constant 858993459 : i32
    %1 = vector.broadcast %c858993459_i32 : i32 to vector<2x128xi32>
    %2 = arith.cmpi uge, %0, %1 : vector<2x128xi32>
    %c0_1 = arith.constant 0 : index
    %c0_2 = arith.constant 0 : index
    %3 = vector.load %arg1[%c0_1, %c0_2] : memref<2x128xf32, #tpu.memory_space<vmem>>, vector<2x128xf32>
    %cst = arith.constant 1.250000e+00 : f32
    %4 = vector.broadcast %cst : f32 to vector<2x128xf32>
    %5 = arith.mulf %3, %4 : vector<2x128xf32>
    %cst_3 = arith.constant 0.000000e+00 : f32
    %6 = vector.broadcast %cst_3 : f32 to vector<2x128xf32>
    %7 = arith.select %2, %5, %6 : vector<2x128xi1>, vector<2x128xf32>
    %c0_4 = arith.constant 0 : index
    %c0_5 = arith.constant 0 : index
    %8 = vector.load %arg3[%c0_4, %c0_5] : memref<2x128xf32, #tpu.memory_space<vmem>>, vector<2x128xf32>
    tpu.vector_store %arg3[%c0_4, %c0_5], %7 {strides = array<i32>} : memref<2x128xf32, #tpu.memory_space<vmem>>, vector<2x128xf32>,
    return
  }
  func.func @transform_0(%arg0: i32) -> (i32, i32) {
    %c0_i32 = arith.constant 0 : i32
    %c0_i32_0 = arith.constant 0 : i32
    return %arg0, %c0_i32 : i32, i32
  }
  func.func @transform_1(%arg0: i32) -> (i32, i32) {
    %c0_i32 = arith.constant 0 : i32
    %c0_i32_0 = arith.constant 0 : i32
    return %arg0, %c0_i32 : i32, i32
  }
  func.func @transform_2(%arg0: i32) -> (i32, i32) {
    %c0_i32 = arith.constant 0 : i32
    %c0_i32_0 = arith.constant 0 : i32
    return %arg0, %c0_i32 : i32, i32
  }
}

</mosaic_0001>

<bundles_post_ra>
// kernel: tpu_custom_call.1
= control target key start
LH: loop header
LB: loop body
LE: loop exit
PB: predicated region body
PF: predicated region fallthrough
CT: control target
= control target key end

     0   :  { %7 = vsyncpa [#allocation3], 0  ;;  %s175_s0 = inlined_call_operand.hbm [shape: f32[2,128], index: 0, kind: input, shape index: {}]   ;;  %s176_s1 = inlined_call_operand.hbm [shape: u32[2,128], index: 1, kind: input, shape index: {}]   ;;  %s177_s2 = inlined_call_operand.hbm [shape: f32[2,128], index: 2, kind: output, shape index: {}]  }
   0x1   :  { %8 = vsyncpa [#allocation6], 0 }
   0x2   :  { %9 = vsyncpa [#allocation4], 0  ;;  %s15_s11 = sshll.u32 %s175_s0, 4  ;;  %s148_s12 = smov [#allocation2]   ;;  %s16_s11 = int_to_ptr.hbm [resolvable:$true] %s15_s11 }
   0x3   :  { %s17_s13 = sshll.u32 %s148_s12, 4  ;;  %s26_s16 = sshll.u32 %s176_s1, 4  ;;  %s18_s13 = int_to_ptr.vmem [resolvable:$true] %s17_s13  ;;  %s27_s16 = int_to_ptr.hbm [resolvable:$true] %s26_s16 }
   0x4   :  { %20 = dma.hbm_to_vmem [thread:$0]  %s16_s11, 32, %s18_s13, [#allocation3]  }
   0x5   :  { %s149_s17 = smov [#allocation5]  }
   0x6   :  { %s28_s18 = sshll.u32 %s149_s17, 4  ;;  %s29_s18 = int_to_ptr.vmem [resolvable:$true] %s28_s18 }
   0x7   :  { %31 = dma.hbm_to_vmem [thread:$0]  %s27_s16, 32, %s29_s18, [#allocation6]  }
   0x8   :  { %142 = dma.done.wait [#allocation3], 32  }
   0x9   :  { %143 = vsyncadd [#allocation3], 4294967264 }
   0xa   :  { %144 = dma.done.wait [#allocation6], 32  }
   0xb   :  { %145 = vsyncadd [#allocation6], 4294967264  ;;  %v40_v0 = vld [vmem:[#allocation5] sm:$0x3]  ;;  %v44_v1 = vld [vmem:[#allocation2] sm:$0x3] }
   0xc   :  { %s150_s0 = smov [#allocation7]   ;;  %s55_s22 = sshll.u32 %s177_s2, 4  ;;  %v66_v2 = vxor.u32 2147483648, %v40_v0  ;;  %v45_v3 = vmul.f32 1.25, %v44_v1  ;;  %s56_s22 = int_to_ptr.hbm [resolvable:$true] %s55_s22 }
   0xd   :  { %s53_s19 = sshll.u32 %s150_s0, 4  ;;  %s54_s19 = int_to_ptr.vmem [resolvable:$true] %s53_s19 }
   0xe   :  { %vm43_vm0 = vcmp.ge.s32.totalorder %v66_v2, 3006477107 }
   0xf   :  { %v46_v4 = vsel %vm43_vm0, %v45_v3, 0.0 }
  0x10   :  { %47 = vst [vmem:[#allocation7] sm:$0x3] %v46_v4 }
  0x11   :  { %58 = dma.vmem_to_hbm [thread:$0]  %s54_s19, 32, %s56_s22, [#allocation4]  }
  0x12   :  { %146 = dma.done.wait [#allocation4], 32  }
  0x13   :  { %147 = vsyncadd [#allocation4], 4294967264 }
  0x14   :  { %63 = vsyncpa [#allocation3], 1 }
  0x15   :  { %64 = vsyncpa [#allocation6], 1 }
  0x16   :  { %65 = vsyncpa [#allocation4], 1 }

</bundles_post_ra>
